<compile_context>
chip_gen: v6e
topology: v6e:2x2x1
jax: 0.10.0
libtpu: 0.0.40
codegen_flags: <defaults>
</compile_context>

<pallas_src>
import functools

import jax
import jax.numpy as jnp
from jax import lax
from jax.experimental import pallas as pl
from jax.experimental.pallas import tpu as pltpu

N_C = 4          # channels (n_c)
KERNEL = 3
DILATION = 1
P_DROP = 0.15    # Dropout prob (identity at inference time)
EPS = 1e-6       # InstanceNorm2d eps


def _get_same_padding(kernel: int, dilation: int) -> int:
    return (kernel + (kernel - 1) * (dilation - 1) - 1) // 2


def _elu(x):
    # ELU(alpha=1): x if x > 0 else exp(x) - 1   (exp runs on the EUP slot)
    return jnp.where(x > 0, x, jnp.exp(x) - 1.0)


def _resblock_kernel(x_ref, w1_ref, g1_ref, b1_ref, w2_ref, g2_ref, b2_ref,
                     mask_ref, out_ref, patches_ref, *, C, HW, K, shifts):
    """Fused ResBlock2D body for one batch sample.

    x_ref       : (1, C, HW)    VMEM lane-dense input sample
    w*_ref      : (C, K*K*C)    VMEM conv weights; row = out-channel,
                                col = tap*C + in_channel (OHWI order)
    g*,b*_ref   : (C, 1)        VMEM InstanceNorm2d affine params
    mask_ref    : (K*K, HW)     VMEM 0/1 border masks, one row per tap
    out_ref     : (1, C, HW)    VMEM output sample
    patches_ref : (K*K*C, HW)   VMEM scratch, im2col patches
    """
    taps = K * K

    # Hoist per-tap mask rows once (reused by both conv stages).
    mask_rows = [mask_ref[t:t + 1, :] for t in range(taps)]

    def build_patches(src):
        # src: (C, HW). Per tap: one XLU lane rotation of the flattened image
        # + one VPU multiply by the border mask; rows are written tap-major so
        # they line up with the OHWI-flattened weight layout. Every row is
        # overwritten, so no zero-fill of the scratch is needed.
        for t in range(taps):
            shifted = src if shifts[t] == 0 else pltpu.roll(src, shift=shifts[t], axis=1)
            patches_ref[t * C:(t + 1) * C, :] = shifted * mask_rows[t]

    def conv(w_ref):
        # One MXU matmul per conv stage: (C, K*K*C) @ (K*K*C, HW) -> (C, HW).
        # TODO(synk): on v6e/v7x a bf16-operand / f32-accum matmul would halve
        #             operand vregs; kept f32 + HIGHEST to preserve the strict
        #             parity check against the f32 reference.
        return jnp.dot(w_ref[...], patches_ref[...],
                       preferred_element_type=jnp.float32,
                       precision=lax.Precision.HIGHEST)

    def instance_norm(y, g_ref, b_ref):
        # per-(sample, channel) stats over H*W, biased variance, eps inside rsqrt
        mean = jnp.mean(y, axis=1, keepdims=True)
        cent = y - mean
        var = jnp.mean(cent * cent, axis=1, keepdims=True)
        return cent * lax.rsqrt(var + EPS) * g_ref[...] + b_ref[...]

    x = x_ref[0].astype(jnp.float32)                       # (C, HW)

    # ---- stage 1: Conv2d -> InstanceNorm2d -> ELU -> Dropout ----
    build_patches(x)
    h = _elu(instance_norm(conv(w1_ref), g1_ref, b1_ref))
    # TODO(synk): Dropout(p=0.15) is identity in eval mode; training-mode
    #             stochastic mask (pltpu.prng_*) not implemented here.

    # ---- stage 2: Conv2d -> InstanceNorm2d -> residual add -> final ELU ----
    build_patches(h)
    y = instance_norm(conv(w2_ref), g2_ref, b2_ref)
    out_ref[0, :, :] = _elu(x + y).astype(out_ref.dtype)


@functools.partial(jax.jit, static_argnames=("kernel", "dilation"))
def resblock2d(x, w1, g1, b1, w2, g2, b2, *, kernel=KERNEL, dilation=DILATION):
    N, C, H, W = x.shape
    K = kernel
    pad = _get_same_padding(K, dilation)
    HW = H * W
    KKC = K * K * C

    # --- layout plumbing (outside the kernel) ---
    x_flat = x.reshape(N, C, HW)                                   # lane-dense
    # OIHW -> OHWI -> (O, K*K*I): column index = (kh*K + kw)*C + ci
    w1_r = jnp.transpose(w1, (0, 2, 3, 1)).reshape(C, KKC)
    w2_r = jnp.transpose(w2, (0, 2, 3, 1)).reshape(C, KKC)
    g1_r, b1_r = g1.reshape(C, 1), b1.reshape(C, 1)
    g2_r, b2_r = g2.reshape(C, 1), b2.reshape(C, 1)

    # Per-tap static lane shifts and 0/1 border masks for "same" padding.
    hh = jnp.arange(H)[:, None]
    ww = jnp.arange(W)[None, :]
    shifts, masks = [], []
    for kh in range(K):
        for kw in range(K):
            dh = kh * dilation - pad
            dw = kw * dilation - pad
            shifts.append((-(dh * W + dw)) % HW)                   # static int
            valid = ((hh + dh >= 0) & (hh + dh < H) &
                     (ww + dw >= 0) & (ww + dw < W))
            masks.append(valid.reshape(HW))
    mask = jnp.stack(masks).astype(x.dtype)                        # (K*K, HW)

    kern = functools.partial(_resblock_kernel, C=C, HW=HW, K=K,
                             shifts=tuple(shifts))

    out_flat = pl.pallas_call(
        kern,
        out_shape=jax.ShapeDtypeStruct((N, C, HW), x.dtype),
        grid=(N,),
        in_specs=[
            pl.BlockSpec((1, C, HW), lambda n: (n, 0, 0)),   # x (per sample)
            pl.BlockSpec((C, KKC), lambda n: (0, 0)),        # w1
            pl.BlockSpec((C, 1), lambda n: (0, 0)),          # gamma1
            pl.BlockSpec((C, 1), lambda n: (0, 0)),          # beta1
            pl.BlockSpec((C, KKC), lambda n: (0, 0)),        # w2
            pl.BlockSpec((C, 1), lambda n: (0, 0)),          # gamma2
            pl.BlockSpec((C, 1), lambda n: (0, 0)),          # beta2
            pl.BlockSpec((K * K, HW), lambda n: (0, 0)),     # border masks
        ],
        out_specs=pl.BlockSpec((1, C, HW), lambda n: (n, 0, 0)),
        scratch_shapes=[pltpu.VMEM((KKC, HW), jnp.float32)],  # im2col patches
        compiler_params=pltpu.CompilerParams(
            dimension_semantics=("parallel",)),               # megacore on v7x
    )(x_flat, w1_r, g1_r, b1_r, w2_r, g2_r, b2_r, mask)

    return out_flat.reshape(N, C, H, W)


def _reference(x, w1, g1, b1, w2, g2, b2, kernel=KERNEL, dilation=DILATION):
    """Pure-JAX reference matching the PyTorch module (eval mode)."""
    pad = _get_same_padding(kernel, dilation)

    def conv(v, w):
        return lax.conv_general_dilated(
            v, w, window_strides=(1, 1), padding=((pad, pad), (pad, pad)),
            rhs_dilation=(dilation, dilation),
            dimension_numbers=("NCHW", "OIHW", "NCHW"),
            precision=lax.Precision.HIGHEST)

    def inorm(v, g, b):
        mean = v.mean(axis=(2, 3), keepdims=True)
        var = ((v - mean) ** 2).mean(axis=(2, 3), keepdims=True)
        return ((v - mean) * lax.rsqrt(var + EPS)
                * g[None, :, None, None] + b[None, :, None, None])

    h = _elu(inorm(conv(x, w1), g1, b1))
    h = inorm(conv(h, w2), g2, b2)
    return _elu(x + h)


if __name__ == "__main__":
    key = jax.random.PRNGKey(0)
    kx, kw1, kw2, kg1, kb1, kg2, kb2 = jax.random.split(key, 7)

    N, C, H, W, K = 2, N_C, 16, 16, KERNEL
    x = jax.random.normal(kx, (N, C, H, W), jnp.float32)

    # Deterministic synthetic parameters (Conv2d bias=False; InstanceNorm affine).
    w1 = 0.1 * jax.random.normal(kw1, (C, C, K, K), jnp.float32)
    w2 = 0.1 * jax.random.normal(kw2, (C, C, K, K), jnp.float32)
    g1 = 1.0 + 0.1 * jax.random.normal(kg1, (C,), jnp.float32)
    b1 = 0.1 * jax.random.normal(kb1, (C,), jnp.float32)
    g2 = 1.0 + 0.1 * jax.random.normal(kg2, (C,), jnp.float32)
    b2 = 0.1 * jax.random.normal(kb2, (C,), jnp.float32)

    out = resblock2d(x, w1, g1, b1, w2, g2, b2)
    out = jax.block_until_ready(out)

    ref = _reference(x, w1, g1, b1, w2, g2, b2)
    assert out.shape == x.shape and out.dtype == x.dtype
    max_err = float(jnp.max(jnp.abs(out - ref)))
    assert jnp.allclose(out, ref, atol=2e-3, rtol=2e-3), f"max_err={max_err}"

    print("KERNEL_OK")
</pallas_src>

<mosaic_0001>
module attributes {stable_mosaic.version = 11 : i64} {
  func.func @_resblock_kernel(%arg0: i32, %arg1: memref<1x4x256xf32, #tpu.memory_space<vmem>>, %arg2: memref<4x36xf32, #tpu.memory_space<vmem>>, %arg3: memref<4x1xf32, #tpu.memory_space<vmem>>, %arg4: memref<4x1xf32, #tpu.memory_space<vmem>>, %arg5: memref<4x36xf32, #tpu.memory_space<vmem>>, %arg6: memref<4x1xf32, #tpu.memory_space<vmem>>, %arg7: memref<4x1xf32, #tpu.memory_space<vmem>>, %arg8: memref<9x256xf32, #tpu.memory_space<vmem>>, %arg9: memref<1x4x256xf32, #tpu.memory_space<vmem>>, %arg10: memref<36x256xf32, #tpu.memory_space<vmem>>) attributes {dimension_semantics = [#tpu.dimension_semantics<parallel>], iteration_bounds = array<i64: 2>, scalar_prefetch = 0 : i64, scratch_operands = 1 : i64, tpu.core_type = #tpu.core_type<tc>, window_params = [{transform_indices = @transform_0, window_bounds = array<i64: 1, 4, 256>}, {pipeline_mode = #tpu.pipeline_mode<synchronous>, transform_indices = @transform_1, window_bounds = array<i64: 4, 36>}, {pipeline_mode = #tpu.pipeline_mode<synchronous>, transform_indices = @transform_2, window_bounds = array<i64: 4, 1>}, {pipeline_mode = #tpu.pipeline_mode<synchronous>, transform_indices = @transform_3, window_bounds = array<i64: 4, 1>}, {pipeline_mode = #tpu.pipeline_mode<synchronous>, transform_indices = @transform_4, window_bounds = array<i64: 4, 36>}, {pipeline_mode = #tpu.pipeline_mode<synchronous>, transform_indices = @transform_5, window_bounds = array<i64: 4, 1>}, {pipeline_mode = #tpu.pipeline_mode<synchronous>, transform_indices = @transform_6, window_bounds = array<i64: 4, 1>}, {pipeline_mode = #tpu.pipeline_mode<synchronous>, transform_indices = @transform_7, window_bounds = array<i64: 9, 256>}, {transform_indices = @transform_8, window_bounds = array<i64: 1, 4, 256>}]} {
    %c0 = arith.constant 0 : index
    %c0_0 = arith.constant 0 : index
    %0 = vector.load %arg8[%c0, %c0_0] : memref<9x256xf32, #tpu.memory_space<vmem>>, vector<1x256xf32>
    %c1 = arith.constant 1 : index
    %c0_1 = arith.constant 0 : index
    %1 = vector.load %arg8[%c1, %c0_1] : memref<9x256xf32, #tpu.memory_space<vmem>>, vector<1x256xf32>
    %c2 = arith.constant 2 : index
    %c0_2 = arith.constant 0 : index
    %2 = vector.load %arg8[%c2, %c0_2] : memref<9x256xf32, #tpu.memory_space<vmem>>, vector<1x256xf32>
    %c3 = arith.constant 3 : index
    %c0_3 = arith.constant 0 : index
    %3 = vector.load %arg8[%c3, %c0_3] : memref<9x256xf32, #tpu.memory_space<vmem>>, vector<1x256xf32>
    %c4 = arith.constant 4 : index
    %c0_4 = arith.constant 0 : index
    %4 = vector.load %arg8[%c4, %c0_4] : memref<9x256xf32, #tpu.memory_space<vmem>>, vector<1x256xf32>
    %c5 = arith.constant 5 : index
    %c0_5 = arith.constant 0 : index
    %5 = vector.load %arg8[%c5, %c0_5] : memref<9x256xf32, #tpu.memory_space<vmem>>, vector<1x256xf32>
    %c6 = arith.constant 6 : index
    %c0_6 = arith.constant 0 : index
    %6 = vector.load %arg8[%c6, %c0_6] : memref<9x256xf32, #tpu.memory_space<vmem>>, vector<1x256xf32>
    %c7 = arith.constant 7 : index
    %c0_7 = arith.constant 0 : index
    %7 = vector.load %arg8[%c7, %c0_7] : memref<9x256xf32, #tpu.memory_space<vmem>>, vector<1x256xf32>
    %c8 = arith.constant 8 : index
    %c0_8 = arith.constant 0 : index
    %8 = vector.load %arg8[%c8, %c0_8] : memref<9x256xf32, #tpu.memory_space<vmem>>, vector<1x256xf32>
    %c0_9 = arith.constant 0 : index
    %c0_10 = arith.constant 0 : index
    %c0_11 = arith.constant 0 : index
    %9 = vector.load %arg1[%c0_9, %c0_10, %c0_11] : memref<1x4x256xf32, #tpu.memory_space<vmem>>, vector<1x4x256xf32>
    %10 = vector.shape_cast %9 : vector<1x4x256xf32> to vector<4x256xf32>
    %c17_i32 = arith.constant 17 : i32
    %11 = tpu.dynamic_rotate %10 by %c17_i32 dim 1 : vector<4x256xf32>, i32 -> vector<4x256xf32>
    %12 = vector.broadcast %0 : vector<1x256xf32> to vector<4x256xf32>
    %13 = arith.mulf %11, %12 : vector<4x256xf32>
    %c0_12 = arith.constant 0 : index
    %c0_13 = arith.constant 0 : index
    %14 = vector.load %arg10[%c0_12, %c0_13] : memref<36x256xf32, #tpu.memory_space<vmem>>, vector<4x256xf32>
    tpu.vector_store %arg10[%c0_12, %c0_13], %13 {strides = array<i32>} : memref<36x256xf32, #tpu.memory_space<vmem>>, vector<4x256xf32>,
    %c16_i32 = arith.constant 16 : i32
    %15 = tpu.dynamic_rotate %10 by %c16_i32 dim 1 : vector<4x256xf32>, i32 -> vector<4x256xf32>
    %16 = vector.broadcast %1 : vector<1x256xf32> to vector<4x256xf32>
    %17 = arith.mulf %15, %16 : vector<4x256xf32>
    %c4_14 = arith.constant 4 : index
    %c0_15 = arith.constant 0 : index
    %18 = vector.load %arg10[%c4_14, %c0_15] : memref<36x256xf32, #tpu.memory_space<vmem>>, vector<4x256xf32>
    tpu.vector_store %arg10[%c4_14, %c0_15], %17 {strides = array<i32>} : memref<36x256xf32, #tpu.memory_space<vmem>>, vector<4x256xf32>,
    %c15_i32 = arith.constant 15 : i32
    %19 = tpu.dynamic_rotate %10 by %c15_i32 dim 1 : vector<4x256xf32>, i32 -> vector<4x256xf32>
    %20 = vector.broadcast %2 : vector<1x256xf32> to vector<4x256xf32>
    %21 = arith.mulf %19, %20 : vector<4x256xf32>
    %c8_16 = arith.constant 8 : index
    %c0_17 = arith.constant 0 : index
    %22 = vector.load %arg10[%c8_16, %c0_17] : memref<36x256xf32, #tpu.memory_space<vmem>>, vector<4x256xf32>
    tpu.vector_store %arg10[%c8_16, %c0_17], %21 {strides = array<i32>} : memref<36x256xf32, #tpu.memory_space<vmem>>, vector<4x256xf32>,
    %c1_i32 = arith.constant 1 : i32
    %23 = tpu.dynamic_rotate %10 by %c1_i32 dim 1 : vector<4x256xf32>, i32 -> vector<4x256xf32>
    %24 = vector.broadcast %3 : vector<1x256xf32> to vector<4x256xf32>
    %25 = arith.mulf %23, %24 : vector<4x256xf32>
    %c12 = arith.constant 12 : index
    %c0_18 = arith.constant 0 : index
    %26 = vector.load %arg10[%c12, %c0_18] : memref<36x256xf32, #tpu.memory_space<vmem>>, vector<4x256xf32>
    tpu.vector_store %arg10[%c12, %c0_18], %25 {strides = array<i32>} : memref<36x256xf32, #tpu.memory_space<vmem>>, vector<4x256xf32>,
    %27 = vector.broadcast %4 : vector<1x256xf32> to vector<4x256xf32>
    %28 = arith.mulf %10, %27 : vector<4x256xf32>
    %c16 = arith.constant 16 : index
    %c0_19 = arith.constant 0 : index
    %29 = vector.load %arg10[%c16, %c0_19] : memref<36x256xf32, #tpu.memory_space<vmem>>, vector<4x256xf32>
    tpu.vector_store %arg10[%c16, %c0_19], %28 {strides = array<i32>} : memref<36x256xf32, #tpu.memory_space<vmem>>, vector<4x256xf32>,
    %c255_i32 = arith.constant 255 : i32
    %30 = tpu.dynamic_rotate %10 by %c255_i32 dim 1 : vector<4x256xf32>, i32 -> vector<4x256xf32>
    %31 = vector.broadcast %5 : vector<1x256xf32> to vector<4x256xf32>
    %32 = arith.mulf %30, %31 : vector<4x256xf32>
    %c20 = arith.constant 20 : index
    %c0_20 = arith.constant 0 : index
    %33 = vector.load %arg10[%c20, %c0_20] : memref<36x256xf32, #tpu.memory_space<vmem>>, vector<4x256xf32>
    tpu.vector_store %arg10[%c20, %c0_20], %32 {strides = array<i32>} : memref<36x256xf32, #tpu.memory_space<vmem>>, vector<4x256xf32>,
    %c241_i32 = arith.constant 241 : i32
    %34 = tpu.dynamic_rotate %10 by %c241_i32 dim 1 : vector<4x256xf32>, i32 -> vector<4x256xf32>
    %35 = vector.broadcast %6 : vector<1x256xf32> to vector<4x256xf32>
    %36 = arith.mulf %34, %35 : vector<4x256xf32>
    %c24 = arith.constant 24 : index
    %c0_21 = arith.constant 0 : index
    %37 = vector.load %arg10[%c24, %c0_21] : memref<36x256xf32, #tpu.memory_space<vmem>>, vector<4x256xf32>
    tpu.vector_store %arg10[%c24, %c0_21], %36 {strides = array<i32>} : memref<36x256xf32, #tpu.memory_space<vmem>>, vector<4x256xf32>,
    %c240_i32 = arith.constant 240 : i32
    %38 = tpu.dynamic_rotate %10 by %c240_i32 dim 1 : vector<4x256xf32>, i32 -> vector<4x256xf32>
    %39 = vector.broadcast %7 : vector<1x256xf32> to vector<4x256xf32>
    %40 = arith.mulf %38, %39 : vector<4x256xf32>
    %c28 = arith.constant 28 : index
    %c0_22 = arith.constant 0 : index
    %41 = vector.load %arg10[%c28, %c0_22] : memref<36x256xf32, #tpu.memory_space<vmem>>, vector<4x256xf32>
    tpu.vector_store %arg10[%c28, %c0_22], %40 {strides = array<i32>} : memref<36x256xf32, #tpu.memory_space<vmem>>, vector<4x256xf32>,
    %c239_i32 = arith.constant 239 : i32
    %42 = tpu.dynamic_rotate %10 by %c239_i32 dim 1 : vector<4x256xf32>, i32 -> vector<4x256xf32>
    %43 = vector.broadcast %8 : vector<1x256xf32> to vector<4x256xf32>
    %44 = arith.mulf %42, %43 : vector<4x256xf32>
    %c32 = arith.constant 32 : index
    %c0_23 = arith.constant 0 : index
    %45 = vector.load %arg10[%c32, %c0_23] : memref<36x256xf32, #tpu.memory_space<vmem>>, vector<4x256xf32>
    tpu.vector_store %arg10[%c32, %c0_23], %44 {strides = array<i32>} : memref<36x256xf32, #tpu.memory_space<vmem>>, vector<4x256xf32>,
    %c0_24 = arith.constant 0 : index
    %c0_25 = arith.constant 0 : index
    %46 = vector.load %arg2[%c0_24, %c0_25] : memref<4x36xf32, #tpu.memory_space<vmem>>, vector<4x36xf32>
    %c0_26 = arith.constant 0 : index
    %c0_27 = arith.constant 0 : index
    %47 = vector.load %arg10[%c0_26, %c0_27] : memref<36x256xf32, #tpu.memory_space<vmem>>, vector<36x256xf32>
    %cst = arith.constant dense<0.000000e+00> : vector<4x256xf32>
    %48 = tpu.matmul %46, %47, %cst {dimension_numbers = #tpu.dot_dimension_numbers<[1], [0], [0], [1], [0, 0, 1, 1], [], []>, precision = #tpu.contract_precision<fp32>} : vector<4x36xf32>, vector<36x256xf32>, vector<4x256xf32> -> vector<4x256xf32>
    %cst_28 = arith.constant dense<0.000000e+00> : vector<4xf32>
    %49 = vector.multi_reduction <add>, %48, %cst_28 [1] : vector<4x256xf32> to vector<4xf32>
    %50 = vector.shape_cast %49 : vector<4xf32> to vector<4x1xf32>
    %cst_29 = arith.constant 2.560000e+02 : f32
    %51 = vector.broadcast %cst_29 : f32 to vector<4x1xf32>
    %52 = arith.divf %50, %51 : vector<4x1xf32>
    %53 = vector.broadcast %52 : vector<4x1xf32> to vector<4x256xf32>
    %54 = arith.subf %48, %53 : vector<4x256xf32>
    %55 = arith.mulf %54, %54 : vector<4x256xf32>
    %cst_30 = arith.constant dense<0.000000e+00> : vector<4xf32>
    %56 = vector.multi_reduction <add>, %55, %cst_30 [1] : vector<4x256xf32> to vector<4xf32>
    %57 = vector.shape_cast %56 : vector<4xf32> to vector<4x1xf32>
    %cst_31 = arith.constant 2.560000e+02 : f32
    %58 = vector.broadcast %cst_31 : f32 to vector<4x1xf32>
    %59 = arith.divf %57, %58 : vector<4x1xf32>
    %cst_32 = arith.constant 9.99999997E-7 : f32
    %60 = vector.broadcast %cst_32 : f32 to vector<4x1xf32>
    %61 = arith.addf %59, %60 : vector<4x1xf32>
    %62 = math.rsqrt %61 : vector<4x1xf32>
    %63 = vector.broadcast %62 : vector<4x1xf32> to vector<4x256xf32>
    %64 = arith.mulf %54, %63 : vector<4x256xf32>
    %c0_33 = arith.constant 0 : index
    %c0_34 = arith.constant 0 : index
    %65 = vector.load %arg3[%c0_33, %c0_34] : memref<4x1xf32, #tpu.memory_space<vmem>>, vector<4x1xf32>
    %66 = vector.broadcast %65 : vector<4x1xf32> to vector<4x256xf32>
    %67 = arith.mulf %64, %66 : vector<4x256xf32>
    %c0_35 = arith.constant 0 : index
    %c0_36 = arith.constant 0 : index
    %68 = vector.load %arg4[%c0_35, %c0_36] : memref<4x1xf32, #tpu.memory_space<vmem>>, vector<4x1xf32>
    %69 = vector.broadcast %68 : vector<4x1xf32> to vector<4x256xf32>
    %70 = arith.addf %67, %69 : vector<4x256xf32>
    %cst_37 = arith.constant 0.000000e+00 : f32
    %71 = vector.broadcast %cst_37 : f32 to vector<4x256xf32>
    %72 = arith.cmpf ogt, %70, %71 : vector<4x256xf32>
    %73 = math.exp %70 : vector<4x256xf32>
    %cst_38 = arith.constant 1.000000e+00 : f32
    %74 = vector.broadcast %cst_38 : f32 to vector<4x256xf32>
    %75 = arith.subf %73, %74 : vector<4x256xf32>
    %76 = arith.select %72, %70, %75 : vector<4x256xi1>, vector<4x256xf32>
    %c17_i32_39 = arith.constant 17 : i32
    %77 = tpu.dynamic_rotate %76 by %c17_i32_39 dim 1 : vector<4x256xf32>, i32 -> vector<4x256xf32>
    %78 = vector.broadcast %0 : vector<1x256xf32> to vector<4x256xf32>
    %79 = arith.mulf %77, %78 : vector<4x256xf32>
    %c0_40 = arith.constant 0 : index
    %c0_41 = arith.constant 0 : index
    %80 = vector.load %arg10[%c0_40, %c0_41] : memref<36x256xf32, #tpu.memory_space<vmem>>, vector<4x256xf32>
    tpu.vector_store %arg10[%c0_40, %c0_41], %79 {strides = array<i32>} : memref<36x256xf32, #tpu.memory_space<vmem>>, vector<4x256xf32>,
    %c16_i32_42 = arith.constant 16 : i32
    %81 = tpu.dynamic_rotate %76 by %c16_i32_42 dim 1 : vector<4x256xf32>, i32 -> vector<4x256xf32>
    %82 = vector.broadcast %1 : vector<1x256xf32> to vector<4x256xf32>
    %83 = arith.mulf %81, %82 : vector<4x256xf32>
    %c4_43 = arith.constant 4 : index
    %c0_44 = arith.constant 0 : index
    %84 = vector.load %arg10[%c4_43, %c0_44] : memref<36x256xf32, #tpu.memory_space<vmem>>, vector<4x256xf32>
    tpu.vector_store %arg10[%c4_43, %c0_44], %83 {strides = array<i32>} : memref<36x256xf32, #tpu.memory_space<vmem>>, vector<4x256xf32>,
    %c15_i32_45 = arith.constant 15 : i32
    %85 = tpu.dynamic_rotate %76 by %c15_i32_45 dim 1 : vector<4x256xf32>, i32 -> vector<4x256xf32>
    %86 = vector.broadcast %2 : vector<1x256xf32> to vector<4x256xf32>
    %87 = arith.mulf %85, %86 : vector<4x256xf32>
    %c8_46 = arith.constant 8 : index
    %c0_47 = arith.constant 0 : index
    %88 = vector.load %arg10[%c8_46, %c0_47] : memref<36x256xf32, #tpu.memory_space<vmem>>, vector<4x256xf32>
    tpu.vector_store %arg10[%c8_46, %c0_47], %87 {strides = array<i32>} : memref<36x256xf32, #tpu.memory_space<vmem>>, vector<4x256xf32>,
    %c1_i32_48 = arith.constant 1 : i32
    %89 = tpu.dynamic_rotate %76 by %c1_i32_48 dim 1 : vector<4x256xf32>, i32 -> vector<4x256xf32>
    %90 = vector.broadcast %3 : vector<1x256xf32> to vector<4x256xf32>
    %91 = arith.mulf %89, %90 : vector<4x256xf32>
    %c12_49 = arith.constant 12 : index
    %c0_50 = arith.constant 0 : index
    %92 = vector.load %arg10[%c12_49, %c0_50] : memref<36x256xf32, #tpu.memory_space<vmem>>, vector<4x256xf32>
    tpu.vector_store %arg10[%c12_49, %c0_50], %91 {strides = array<i32>} : memref<36x256xf32, #tpu.memory_space<vmem>>, vector<4x256xf32>,
    %93 = vector.broadcast %4 : vector<1x256xf32> to vector<4x256xf32>
    %94 = arith.mulf %76, %93 : vector<4x256xf32>
    %c16_51 = arith.constant 16 : index
    %c0_52 = arith.constant 0 : index
    %95 = vector.load %arg10[%c16_51, %c0_52] : memref<36x256xf32, #tpu.memory_space<vmem>>, vector<4x256xf32>
    tpu.vector_store %arg10[%c16_51, %c0_52], %94 {strides = array<i32>} : memref<36x256xf32, #tpu.memory_space<vmem>>, vector<4x256xf32>,
    %c255_i32_53 = arith.constant 255 : i32
    %96 = tpu.dynamic_rotate %76 by %c255_i32_53 dim 1 : vector<4x256xf32>, i32 -> vector<4x256xf32>
    %97 = vector.broadcast %5 : vector<1x256xf32> to vector<4x256xf32>
    %98 = arith.mulf %96, %97 : vector<4x256xf32>
    %c20_54 = arith.constant 20 : index
    %c0_55 = arith.constant 0 : index
    %99 = vector.load %arg10[%c20_54, %c0_55] : memref<36x256xf32, #tpu.memory_space<vmem>>, vector<4x256xf32>
    tpu.vector_store %arg10[%c20_54, %c0_55], %98 {strides = array<i32>} : memref<36x256xf32, #tpu.memory_space<vmem>>, vector<4x256xf32>,
    %c241_i32_56 = arith.constant 241 : i32
    %100 = tpu.dynamic_rotate %76 by %c241_i32_56 dim 1 : vector<4x256xf32>, i32 -> vector<4x256xf32>
    %101 = vector.broadcast %6 : vector<1x256xf32> to vector<4x256xf32>
    %102 = arith.mulf %100, %101 : vector<4x256xf32>
    %c24_57 = arith.constant 24 : index
    %c0_58 = arith.constant 0 : index
    %103 = vector.load %arg10[%c24_57, %c0_58] : memref<36x256xf32, #tpu.memory_space<vmem>>, vector<4x256xf32>
    tpu.vector_store %arg10[%c24_57, %c0_58], %102 {strides = array<i32>} : memref<36x256xf32, #tpu.memory_space<vmem>>, vector<4x256xf32>,
    %c240_i32_59 = arith.constant 240 : i32
    %104 = tpu.dynamic_rotate %76 by %c240_i32_59 dim 1 : vector<4x256xf32>, i32 -> vector<4x256xf32>
    %105 = vector.broadcast %7 : vector<1x256xf32> to vector<4x256xf32>
    %106 = arith.mulf %104, %105 : vector<4x256xf32>
    %c28_60 = arith.constant 28 : index
    %c0_61 = arith.constant 0 : index
    %107 = vector.load %arg10[%c28_60, %c0_61] : memref<36x256xf32, #tpu.memory_space<vmem>>, vector<4x256xf32>
    tpu.vector_store %arg10[%c28_60, %c0_61], %106 {strides = array<i32>} : memref<36x256xf32, #tpu.memory_space<vmem>>, vector<4x256xf32>,
    %c239_i32_62 = arith.constant 239 : i32
    %108 = tpu.dynamic_rotate %76 by %c239_i32_62 dim 1 : vector<4x256xf32>, i32 -> vector<4x256xf32>
    %109 = vector.broadcast %8 : vector<1x256xf32> to vector<4x256xf32>
    %110 = arith.mulf %108, %109 : vector<4x256xf32>
    %c32_63 = arith.constant 32 : index
    %c0_64 = arith.constant 0 : index
    %111 = vector.load %arg10[%c32_63, %c0_64] : memref<36x256xf32, #tpu.memory_space<vmem>>, vector<4x256xf32>
    tpu.vector_store %arg10[%c32_63, %c0_64], %110 {strides = array<i32>} : memref<36x256xf32, #tpu.memory_space<vmem>>, vector<4x256xf32>,
    %c0_65 = arith.constant 0 : index
    %c0_66 = arith.constant 0 : index
    %112 = vector.load %arg5[%c0_65, %c0_66] : memref<4x36xf32, #tpu.memory_space<vmem>>, vector<4x36xf32>
    %c0_67 = arith.constant 0 : index
    %c0_68 = arith.constant 0 : index
    %113 = vector.load %arg10[%c0_67, %c0_68] : memref<36x256xf32, #tpu.memory_space<vmem>>, vector<36x256xf32>
    %cst_69 = arith.constant dense<0.000000e+00> : vector<4x256xf32>
    %114 = tpu.matmul %112, %113, %cst_69 {dimension_numbers = #tpu.dot_dimension_numbers<[1], [0], [0], [1], [0, 0, 1, 1], [], []>, precision = #tpu.contract_precision<fp32>} : vector<4x36xf32>, vector<36x256xf32>, vector<4x256xf32> -> vector<4x256xf32>
    %cst_70 = arith.constant dense<0.000000e+00> : vector<4xf32>
    %115 = vector.multi_reduction <add>, %114, %cst_70 [1] : vector<4x256xf32> to vector<4xf32>
    %116 = vector.shape_cast %115 : vector<4xf32> to vector<4x1xf32>
    %cst_71 = arith.constant 2.560000e+02 : f32
    %117 = vector.broadcast %cst_71 : f32 to vector<4x1xf32>
    %118 = arith.divf %116, %117 : vector<4x1xf32>
    %119 = vector.broadcast %118 : vector<4x1xf32> to vector<4x256xf32>
    %120 = arith.subf %114, %119 : vector<4x256xf32>
    %121 = arith.mulf %120, %120 : vector<4x256xf32>
    %cst_72 = arith.constant dense<0.000000e+00> : vector<4xf32>
    %122 = vector.multi_reduction <add>, %121, %cst_72 [1] : vector<4x256xf32> to vector<4xf32>
    %123 = vector.shape_cast %122 : vector<4xf32> to vector<4x1xf32>
    %cst_73 = arith.constant 2.560000e+02 : f32
    %124 = vector.broadcast %cst_73 : f32 to vector<4x1xf32>
    %125 = arith.divf %123, %124 : vector<4x1xf32>
    %cst_74 = arith.constant 9.99999997E-7 : f32
    %126 = vector.broadcast %cst_74 : f32 to vector<4x1xf32>
    %127 = arith.addf %125, %126 : vector<4x1xf32>
    %128 = math.rsqrt %127 : vector<4x1xf32>
    %129 = vector.broadcast %128 : vector<4x1xf32> to vector<4x256xf32>
    %130 = arith.mulf %120, %129 : vector<4x256xf32>
    %c0_75 = arith.constant 0 : index
    %c0_76 = arith.constant 0 : index
    %131 = vector.load %arg6[%c0_75, %c0_76] : memref<4x1xf32, #tpu.memory_space<vmem>>, vector<4x1xf32>
    %132 = vector.broadcast %131 : vector<4x1xf32> to vector<4x256xf32>
    %133 = arith.mulf %130, %132 : vector<4x256xf32>
    %c0_77 = arith.constant 0 : index
    %c0_78 = arith.constant 0 : index
    %134 = vector.load %arg7[%c0_77, %c0_78] : memref<4x1xf32, #tpu.memory_space<vmem>>, vector<4x1xf32>
    %135 = vector.broadcast %134 : vector<4x1xf32> to vector<4x256xf32>
    %136 = arith.addf %133, %135 : vector<4x256xf32>
    %137 = arith.addf %10, %136 : vector<4x256xf32>
    %cst_79 = arith.constant 0.000000e+00 : f32
    %138 = vector.broadcast %cst_79 : f32 to vector<4x256xf32>
    %139 = arith.cmpf ogt, %137, %138 : vector<4x256xf32>
    %140 = math.exp %137 : vector<4x256xf32>
    %cst_80 = arith.constant 1.000000e+00 : f32
    %141 = vector.broadcast %cst_80 : f32 to vector<4x256xf32>
    %142 = arith.subf %140, %141 : vector<4x256xf32>
    %143 = arith.select %139, %137, %142 : vector<4x256xi1>, vector<4x256xf32>
    %c0_81 = arith.constant 0 : index
    %c0_82 = arith.constant 0 : index
    %c0_83 = arith.constant 0 : index
    %144 = vector.load %arg9[%c0_81, %c0_82, %c0_83] : memref<1x4x256xf32, #tpu.memory_space<vmem>>, vector<1x4x256xf32>
    %145 = vector.shape_cast %144 : vector<1x4x256xf32> to vector<4x256xf32>
    %146 = vector.shape_cast %143 : vector<4x256xf32> to vector<1x4x256xf32>
    tpu.vector_store %arg9[%c0_81, %c0_82, %c0_83], %146 {strides = array<i32>} : memref<1x4x256xf32, #tpu.memory_space<vmem>>, vector<1x4x256xf32>,
    return
  }
  func.func @transform_0(%arg0: i32) -> (i32, i32, i32) {
    %c0_i32 = arith.constant 0 : i32
    %c0_i32_0 = arith.constant 0 : i32
    %c0_i32_1 = arith.constant 0 : i32
    return %arg0, %c0_i32, %c0_i32_0 : i32, i32, i32
  }
  func.func @transform_1(%arg0: i32) -> (i32, i32) {
    %c0_i32 = arith.constant 0 : i32
    %c0_i32_0 = arith.constant 0 : i32
    %c0_i32_1 = arith.constant 0 : i32
    return %c0_i32, %c0_i32_0 : i32, i32
  }
  func.func @transform_2(%arg0: i32) -> (i32, i32) {
    %c0_i32 = arith.constant 0 : i32
    %c0_i32_0 = arith.constant 0 : i32
    %c0_i32_1 = arith.constant 0 : i32
    return %c0_i32, %c0_i32_0 : i32, i32
  }
  func.func @transform_3(%arg0: i32) -> (i32, i32) {
    %c0_i32 = arith.constant 0 : i32
    %c0_i32_0 = arith.constant 0 : i32
    %c0_i32_1 = arith.constant 0 : i32
    return %c0_i32, %c0_i32_0 : i32, i32
  }
  func.func @transform_4(%arg0: i32) -> (i32, i32) {
    %c0_i32 = arith.constant 0 : i32
    %c0_i32_0 = arith.constant 0 : i32
    %c0_i32_1 = arith.constant 0 : i32
    return %c0_i32, %c0_i32_0 : i32, i32
  }
  func.func @transform_5(%arg0: i32) -> (i32, i32) {
    %c0_i32 = arith.constant 0 : i32
    %c0_i32_0 = arith.constant 0 : i32
    %c0_i32_1 = arith.constant 0 : i32
    return %c0_i32, %c0_i32_0 : i32, i32
  }
  func.func @transform_6(%arg0: i32) -> (i32, i32) {
    %c0_i32 = arith.constant 0 : i32
    %c0_i32_0 = arith.constant 0 : i32
    %c0_i32_1 = arith.constant 0 : i32
    return %c0_i32, %c0_i32_0 : i32, i32
  }
  func.func @transform_7(%arg0: i32) -> (i32, i32) {
    %c0_i32 = arith.constant 0 : i32
    %c0_i32_0 = arith.constant 0 : i32
    %c0_i32_1 = arith.constant 0 : i32
    return %c0_i32, %c0_i32_0 : i32, i32
  }
  func.func @transform_8(%arg0: i32) -> (i32, i32, i32) {
    %c0_i32 = arith.constant 0 : i32
    %c0_i32_0 = arith.constant 0 : i32
    %c0_i32_1 = arith.constant 0 : i32
    return %arg0, %c0_i32, %c0_i32_0 : i32, i32, i32
  }
}

</mosaic_0001>

<bundles_post_ra>
// kernel: resblock2d.1
= control target key start
LH: loop header
LB: loop body
LE: loop exit
PB: predicated region body
PF: predicated region fallthrough
CT: control target
= control target key end

     0   :  { %s2104_s27 = smov 0   ;;  %s2661_s0 = inlined_call_operand.vmem [shape: f32[2,4,256], index: 0, kind: input, shape index: {}]   ;;  %s2662_s1 = inlined_call_operand.vmem [shape: f32[4,36], index: 1, kind: input, shape index: {}]   ;;  %s2663_s2 = inlined_call_operand.vmem [shape: f32[4,1], index: 2, kind: input, shape index: {}]   ;;  %s2664_s3 = inlined_call_operand.vmem [shape: f32[4,1], index: 3, kind: input, shape index: {}]   ;;  %s2665_s4 = inlined_call_operand.vmem [shape: f32[4,36], index: 4, kind: input, shape index: {}]   ;;  %s2666_s5 = inlined_call_operand.vmem [shape: f32[4,1], index: 5, kind: input, shape index: {}]   ;;  %s2667_s6 = inlined_call_operand.vmem [shape: f32[4,1], index: 6, kind: input, shape index: {}]   ;;  %s2668_s7 = inlined_call_operand.vmem [shape: f32[9,256], index: 7, kind: input, shape index: {}]   ;;  %s2669_s8 = inlined_call_operand.vmem [shape: f32[2,4,256], index: 8, kind: output, shape index: {}]  }
   0x1 LB: > { %s1985_s28 = sadd.s32 4294967295, %s2047_s27   ;;  %p1989_p0 = scmp.ge.s32.totalorder %s2047_s27, 1  ;;  %s2047_s27 = sphi %s2104_s27, %s18_s27  }
   0x2   : > { %p262_p1 = scmp.lt.s32.totalorder %s2047_s27, 3 }
   0x4   : > { %p263_p2 = pnand %p1989_p0, %p262_p1 }
   0x5   : > { %p296_p3 = scmp.lt.s32.totalorder (!%p263_p2), %s1985_s28, 1  ;;  %s2049_s13 = smov (!%p263_p2), 112  }
   0x6   : > { %266 = sbr.rel (%p263_p2) target bundleno = 1466 (0x5ba), region = 52  ;;  %s2050_s14 = smov (!%p263_p2), 111  }
   0x7   : > { %s2051_s15 = smov (!%p263_p2), 127   ;;  %s2052_s16 = smov (!%p263_p2), 113  }
   0x8   : > { %s2053_s17 = smov (!%p263_p2), 1   ;;  %s2054_s18 = smov (!%p263_p2), 16  }
   0x9   : > { %s2055_s19 = smov (!%p263_p2), 15   ;;  %s2056_s20 = smov (!%p263_p2), 17  }
   0xb   : > { %v331_v0 = vlaneseq  ;;  %s2671_s28 = smov (!%p296_p3, %s1985_s28), 1  ;;  %v1997_v2 = vld [vmem:[%s2668_s7 + $0x4] ss:$8 sm:$0x3]  ;;  %v2057_v12 = vmov 0.0   ;;  %vm559_vm4 = vcmask 293888  }
   0xc   : > { %s2007_s29 = sshll.u32 %s2671_s28, 3  ;;  %644 = vmatprep.mubr.f32.mxu0 %v2057_v12  ;;  %770 = vmatprep.mubr.f32.mxu1 %v2057_v12  ;;  %v2000_v14 = vld [vmem:[%s2668_s7 + $0x7] ss:$8 sm:$0x3]  ;;  %v548_v51 = vld [vmem:[%s2662_s1] sm:$0xf] }
   0xd   : > { %v338_v1 = vshrl.u32 %v331_v0, 7  ;;  %s2120_s10 = scalar_lea.vmem %s2661_s0, %s2007_s29  ;;  %v2156_v13 = vand.u32 127, %v331_v0  ;;  %v1998_v19 = vld [vmem:[%s2668_s7 + $0x5] ss:$8 sm:$0x3]  ;;  %vm563_vm7 = vcmask 1043456   ;;  %s305_s23 = scalar_lea.vmem %s2669_s8, %s2007_s29 }
   0xe   : > { %v323_v3 = vld [vmem:[%s2120_s10] sm:$0xff]  ;;  %v2001_v20 = vld [vmem:[%s2668_s7 + $0x10] ss:$8 sm:$0x3]  ;;  %v561_v59 = vsel %vm559_vm4, %v548_v51, 0 }
   0xf   : > { %v2126_v4 = vsub.s32 0, %v338_v1  ;;  %v2128_v5 = vsub.s32 1, %v338_v1  ;;  %498 = vrot.lane.b32.xlu1 %v323_v3, %s2049_s13  ;;  %526 = vrot.lane.b32.xlu0 %v323_v3, %s2050_s14  ;;  %v325_v6 = vcombine.high %v323_v3, %v323_v3  ;;  %vm502_vm0 = vcmp.lt.s32.totalorder %v2156_v13, 112  ;;  %v1999_v27 = vld [vmem:[%s2668_s7 + $0x6] ss:$8 sm:$0x3] }
  0x10   : > { %vm452_vm1 = vcmp.lt.s32.totalorder %v2156_v13, 127  ;;  %vm530_vm2 = vcmp.lt.s32.totalorder %v2156_v13, 111  ;;  %vm480_vm3 = vcmp.lt.s32.totalorder %v2156_v13, 113  ;;  %v1996_v46 = vld [vmem:[%s2668_s7 + $0x3] ss:$8 sm:$0x3] }
  0x11   : > { %v2133_v7 = vrot.slane %v1997_v2, %v2126_v4  ;;  %v2136_v8 = vrot.slane %v1997_v2, %v2128_v5  ;;  %v2163_v17 = vrot.slane %v2000_v14, %v2126_v4  ;;  %v2166_v18 = vrot.slane %v2000_v14, %v2128_v5  ;;  %v1994_v58 = vld [vmem:[%s2668_s7 + $0x1] ss:$8 sm:$0x3]  ;;  %v1995_v62 = vld [vmem:[%s2668_s7 + $0x2] ss:$8 sm:$0x3] }
  0x12   : > { %v2181_v25 = vrot.slane %v1998_v19, %v2126_v4  ;;  %v2184_v26 = vrot.slane %v1998_v19, %v2128_v5  ;;  %v2192_v30 = vrot.slane %v2001_v20, %v2126_v4  ;;  %v2195_v31 = vrot.slane %v2001_v20, %v2128_v5  ;;  %v306_v63 = vld [vmem:[%s2668_s7] ss:$8 sm:$0x3] }
  0x13   : > { %v440_v9 = vcombine.low %v2133_v7, %v2136_v8  ;;  %448 = vrot.lane.b32.xlu0 %v323_v3, %s2051_s15  ;;  %500 = vrot.lane.b32.xlu1 %v325_v6, %s2049_s13  ;;  %v2199_v36 = vrot.slane %v1999_v27, %v2126_v4  ;;  %v2202_v37 = vrot.slane %v1999_v27, %v2128_v5  ;;  %vm405_vm5 = vcmp.lt.s32.totalorder %v2156_v13, 1 }
  0x14   : > { %v2230_v56 = vrot.slane %v1996_v46, %v2126_v4  ;;  %v2233_v57 = vrot.slane %v1996_v46, %v2128_v5  ;;  %vm355_vm6 = vcmp.lt.s32.totalorder %v2156_v13, 16  ;;  %v2251_v2 = vrot.slane %v1994_v58, %v2126_v4 }
  0x15   : > { %v442_v10 = vmul.f32 %v440_v9, %v323_v3  ;;  %vm383_vm8 = vcmp.lt.s32.totalorder %v2156_v13, 15  ;;  %vm333_vm9 = vcmp.lt.s32.totalorder %v2156_v13, 17  ;;  %v2269_v19 = vrot.slane %v306_v63, %v2126_v4 }
  0x17   : > { %v444_v11 = vcombine.high %v442_v10, %v442_v10  ;;  %446 = vst [vmem:[#allocation2 + $0x48] sm:$0xf] %v442_v10  ;;  %450 = vrot.lane.b32.xlu1 %v325_v6, %s2051_s15  ;;  %528 = vrot.lane.b32.xlu0 %v325_v6, %s2050_s14  ;;  %v2259_v10 = vand.u32 4294901760, %v561_v59 }
  0x19   : > { %447 = vst [vmem:[#allocation2 + $0x28] sm:$0xf] %v444_v11 }
  0x1b   : > { %478 = vrot.lane.b32.xlu1 %v325_v6, %s2052_s16  ;;  %476 = vrot.lane.b32.xlu0 %v323_v3, %s2052_s16 }
  0x1f   : > { %403 = vrot.lane.b32.xlu1 %v325_v6, %s2053_s17  ;;  %401 = vrot.lane.b32.xlu0 %v323_v3, %s2053_s17 }
  0x23   : > { %353 = vrot.lane.b32.xlu1 %v325_v6, %s2054_s18  ;;  %351 = vrot.lane.b32.xlu0 %v323_v3, %s2054_s18 }
  0x27   : > { %381 = vrot.lane.b32.xlu1 %v325_v6, %s2055_s19  ;;  %379 = vrot.lane.b32.xlu0 %v323_v3, %s2055_s19 }
  0x2b   : > { %329 = vrot.lane.b32.xlu1 %v325_v6, %s2056_s20  ;;  %327 = vrot.lane.b32.xlu0 %v323_v3, %s2056_s20  ;;  %v2254_v3 = vrot.slane %v1994_v58, %v2128_v5 }
  0x81   : > { %v499_v15 = vpop.permute.xlu1 %498  ;;  %v527_v16 = vpop.permute.xlu0 %526 }
  0x85   : > { %v449_v21 = vpop.permute.xlu0 %448  ;;  %v501_v22 = vpop.permute.xlu1 %500 }
  0x86   : > { %v503_v23 = vsel %vm502_vm0, %v499_v15, %v501_v22  ;;  %v504_v24 = vsel %vm502_vm0, %v501_v22, %v499_v15  ;;  %v2262_v15 = vrot.slane %v1995_v62, %v2126_v4 }
  0x87   : > { %v516_v28 = vmul.f32 %v2163_v17, %v503_v23  ;;  %v517_v29 = vmul.f32 %v2166_v18, %v504_v24 }
  0x89   : > { %v520_v32 = vrot.slane %v516_v28, 4  ;;  %v521_v33 = vrot.slane %v517_v29, 4  ;;  %v451_v34 = vpop.permute.xlu1 %450  ;;  %v529_v35 = vpop.permute.xlu0 %528 }
  0x8a   : > { %v453_v38 = vsel %vm452_vm1, %v449_v21, %v451_v34  ;;  %v454_v39 = vsel %vm452_vm1, %v451_v34, %v449_v21  ;;  %v531_v40 = vsel %vm530_vm2, %v527_v16, %v529_v35  ;;  %v532_v41 = vsel %vm530_vm2, %v529_v35, %v527_v16 }
  0x8b   : > { %524 = vst [vmem:[#allocation2 + $0x8] sm:$0xf0] %v520_v32  ;;  %525 = vst [vmem:[#allocation2 + $0x20] sm:$0xf0] %v521_v33  ;;  %v466_v42 = vmul.f32 %v2181_v25, %v453_v38  ;;  %v467_v43 = vmul.f32 %v2184_v26, %v454_v39  ;;  %v544_v44 = vmul.f32 %v2192_v30, %v531_v40 }
  0x8c   : > { %v545_v45 = vmul.f32 %v2195_v31, %v532_v41  ;;  %v2265_v16 = vrot.slane %v1995_v62, %v2128_v5  ;;  %v2284_v39 = vrot.slane %v306_v63, %v2128_v5  ;;  %v2287_v40 = vsub.f32 %v561_v59, %v2259_v10 }
  0x8d   : > { %v470_v47 = vrot.slane %v466_v42, 4  ;;  %v471_v48 = vrot.slane %v467_v43, 4  ;;  %546 = vst [vmem:[#allocation2 + $0x40] sm:$0xf] %v544_v44  ;;  %v479_v49 = vpop.permute.xlu1 %478  ;;  %v477_v50 = vpop.permute.xlu0 %476 }
  0x8e   : > { %547 = vst [vmem:[#allocation2 + $0x38] sm:$0xf] %v545_v45  ;;  %v481_v52 = vsel %vm480_vm3, %v477_v50, %v479_v49  ;;  %v482_v53 = vsel %vm480_vm3, %v479_v49, %v477_v50 }
  0x8f   : > { %474 = vst [vmem:[#allocation2 + $0x48] sm:$0xf0] %v470_v47  ;;  %475 = vst [vmem:[#allocation2 + $0x28] sm:$0xf0] %v471_v48  ;;  %v494_v54 = vmul.f32 %v2199_v36, %v481_v52  ;;  %v495_v55 = vmul.f32 %v2202_v37, %v482_v53 }
  0x91   : > { %496 = vst [vmem:[#allocation2 + $0x8] sm:$0xf] %v494_v54  ;;  %497 = vst [vmem:[#allocation2 + $0x20] sm:$0xf] %v495_v55  ;;  %v404_v60 = vpop.permute.xlu1 %403  ;;  %v402_v61 = vpop.permute.xlu0 %401 }
  0x92   : > { %v406_v0 = vsel %vm405_vm5, %v402_v61, %v404_v60  ;;  %v407_v1 = vsel %vm405_vm5, %v404_v60, %v402_v61 }
  0x93   : > { %v419_v6 = vmul.f32 %v2230_v56, %v407_v1  ;;  %v420_v9 = vmul.f32 %v2233_v57, %v406_v0 }
  0x94   : > { %v557_v14 = vld [vmem:[#allocation2 + $0x40] sm:$0xf] }
  0x95   : > { %v558_v11 = vld [vmem:[#allocation2 + $0x38] sm:$0xf]  ;;  %v423_v20 = vrot.slane %v419_v6, 4  ;;  %v424_v21 = vrot.slane %v420_v9, 4  ;;  %v354_v22 = vpop.permute.xlu1 %353  ;;  %v352_v23 = vpop.permute.xlu0 %351  ;;  %v565_v27 = vsel %vm563_vm7, %v557_v14, 0 }
  0x96   : > { %v568_v24 = vsel %vm563_vm7, %v558_v11, 0  ;;  %v356_v28 = vsel %vm355_vm6, %v352_v23, %v354_v22  ;;  %v357_v29 = vsel %vm355_vm6, %v354_v22, %v352_v23  ;;  %v2279_v33 = vand.u32 4294901760, %v565_v27  ;;  %v554_v4 = vld [vmem:[#allocation2 + $0x28] sm:$0xff] }
  0x97   : > { %v2277_v32 = vand.u32 4294901760, %v568_v24  ;;  %v553_v34 = vld [vmem:[#allocation2 + $0x48] sm:$0xff]  ;;  %427 = vst [vmem:[#allocation2 + $0x18] sm:$0xf0] %v423_v20  ;;  %428 = vst [vmem:[#allocation2 + $0x10] sm:$0xf0] %v424_v21  ;;  %v369_v35 = vmul.f32 %v2251_v2, %v357_v29  ;;  %v370_v38 = vmul.f32 %v2254_v3, %v356_v28 }
  0x98   : > { %v556_v41 = vld [vmem:[#allocation2 + $0x20] sm:$0xff]  ;;  %v555_v42 = vld [vmem:[#allocation2 + $0x8] sm:$0xff]  ;;  %v2290_v43 = vand.u32 4294901760, %v554_v4  ;;  %v2292_v44 = vand.u32 4294901760, %v553_v34  ;;  %v2298_v46 = vsub.f32 %v565_v27, %v2279_v33 }
  0x99   : > { %593 = vmatprep.subr.mxu0 %v2277_v32  ;;  %v2295_v45 = vsub.f32 %v568_v24, %v2277_v32  ;;  %v373_v47 = vrot.slane %v369_v35, 4  ;;  %v374_v5 = vrot.slane %v370_v38, 4  ;;  %v382_v48 = vpop.permute.xlu1 %381  ;;  %v380_v49 = vpop.permute.xlu0 %379  ;;  %v2301_v50 = vand.u32 4294901760, %v556_v41 }
  0x9a   : > { %595 = vmatpush1.msra.mxu0 %v2279_v33  ;;  %v2303_v51 = vand.u32 4294901760, %v555_v42  ;;  %v384_v52 = vsel %vm383_vm8, %v380_v49, %v382_v48  ;;  %v385_v53 = vsel %vm383_vm8, %v382_v48, %v380_v49  ;;  %v686_v55 = vand.u32 4294901760, %v2298_v46 }
  0x9b   : > { %v680_v54 = vand.u32 4294901760, %v2295_v45  ;;  %377 = vst [vmem:[#allocation2 + $0x30] sm:$0xf0] %v373_v47  ;;  %378 = vst [vmem:[#allocation2] sm:$0xf0] %v374_v5  ;;  %v397_v58 = vmul.f32 %v2262_v15, %v385_v53  ;;  %v398_v59 = vmul.f32 %v2265_v16, %v384_v52  ;;  %597 = vmatprep.subr.mxu0 %v2301_v50  ;;  %v647_v35 = vand.u32 4294901760, %v2287_v40 }
  0x9c   : > { %v2315_v60 = vsub.f32 %v556_v41, %v2301_v50  ;;  %v2318_v61 = vsub.f32 %v555_v42, %v2303_v51  ;;  %599 = vmatpush1.msra.mxu0 %v2303_v51  ;;  %v687_v63 = vsub.f32 %v2298_v46, %v686_v55  ;;  %v2328_v0 = vsub.f32 %v554_v4, %v2290_v43 }
  0x9d   : > { %v681_v62 = vsub.f32 %v2295_v45, %v680_v54  ;;  %v2331_v1 = vsub.f32 %v553_v34, %v2292_v44  ;;  %399 = vst [vmem:[#allocation2 + $0x18] sm:$0xf] %v397_v58  ;;  %400 = vst [vmem:[#allocation2 + $0x10] sm:$0xf] %v398_v59  ;;  %v330_v6 = vpop.permute.xlu1 %329  ;;  %601 = vmatprep.subr.mxu0 %v2290_v43  ;;  %v328_v9 = vpop.permute.xlu0 %327  ;;  %v648_v52 = vsub.f32 %v2287_v40, %v647_v35 }
  0x9e   : > { %v692_v11 = vand.u32 4294901760, %v2315_v60  ;;  %v698_v14 = vand.u32 4294901760, %v2318_v61  ;;  %v334_v20 = vsel %vm333_vm9, %v328_v9, %v330_v6  ;;  %v335_v21 = vsel %vm333_vm9, %v330_v6, %v328_v9  ;;  %603 = vmatpush1.msra.mxu0 %v2292_v44 }
  0x9f   : > { %v682_v22 = vand.u32 4294901760, %v681_v62  ;;  %v688_v23 = vand.u32 4294901760, %v687_v63  ;;  %v347_v24 = vmul.f32 %v2269_v19, %v335_v21  ;;  %v348_v27 = vmul.f32 %v2284_v39, %v334_v20 }
  0xa0   : > { %v693_v28 = vsub.f32 %v2315_v60, %v692_v11  ;;  %v699_v29 = vsub.f32 %v2318_v61, %v698_v14  ;;  %v704_v4 = vand.u32 4294901760, %v2328_v0  ;;  %v710_v34 = vand.u32 4294901760, %v2331_v1 }
  0xa1   : > { %683 = vmatprep.subr.mxu1 %v682_v22  ;;  %349 = vst [vmem:[#allocation2 + $0x30] sm:$0xf] %v347_v24  ;;  %350 = vst [vmem:[#allocation2] sm:$0xf] %v348_v27  ;;  %v649_v20 = vand.u32 4294901760, %v648_v52 }
  0xa2   : > { %689 = vmatpush1.msra.mxu1 %v688_v23  ;;  %v694_v38 = vand.u32 4294901760, %v693_v28  ;;  %v700_v41 = vand.u32 4294901760, %v699_v29  ;;  %v705_v42 = vsub.f32 %v2328_v0, %v704_v4  ;;  %v711_v47 = vsub.f32 %v2331_v1, %v710_v34 }
  0xa4   : > { %695 = vmatprep.subr.mxu1 %v694_v38  ;;  %v706_v5 = vand.u32 4294901760, %v705_v42  ;;  %v552_v48 = vld [vmem:[#allocation2 + $0x10] sm:$0xff]  ;;  %v551_v49 = vld [vmem:[#allocation2 + $0x18] sm:$0xff]  ;;  %v712_v53 = vand.u32 4294901760, %v711_v47 }
  0xa5   : > { %701 = vmatpush1.msra.mxu1 %v700_v41  ;;  %v2361_v58 = vand.u32 4294901760, %v552_v48  ;;  %v2363_v59 = vand.u32 4294901760, %v551_v49 }
  0xa6   : > { %707 = vmatprep.subr.mxu1 %v706_v5 }
  0xa7   : > { %713 = vmatpush1.msra.mxu1 %v712_v53  ;;  %605 = vmatprep.subr.mxu0 %v2361_v58  ;;  %v715_v62 = vsub.f32 %v552_v48, %v2361_v58  ;;  %v721_v63 = vsub.f32 %v551_v49, %v2363_v59 }
  0xa8   : > { %607 = vmatpush1.msra.mxu0 %v2363_v59  ;;  %v550_v6 = vld [vmem:[#allocation2] sm:$0xff]  ;;  %v549_v9 = vld [vmem:[#allocation2 + $0x30] sm:$0xff] }
  0xa9   : > { %v2369_v21 = vand.u32 4294901760, %v550_v6  ;;  %v2371_v22 = vand.u32 4294901760, %v549_v9  ;;  %v716_v23 = vand.u32 4294901760, %v715_v62  ;;  %v722_v24 = vand.u32 4294901760, %v721_v63 }
  0xab   : > { %609 = vmatprep.subr.mxu0 %v2369_v21  ;;  %v717_v27 = vsub.f32 %v715_v62, %v716_v23  ;;  %v723_v28 = vsub.f32 %v721_v63, %v722_v24  ;;  %v727_v29 = vsub.f32 %v550_v6, %v2369_v21  ;;  %v733_v38 = vsub.f32 %v549_v9, %v2371_v22  ;;  %v1160_v6 = vld [vmem:[%s2663_s2] sm:$0xf] }
  0xac   : > { %611 = vmatpush1.msra.mxu0 %v2371_v22  ;;  %v2058_v9 = vmov 0  }
  0xad   : > { %802 = vmatprep.subr.mxu0 %v2295_v45  ;;  %650 = vmatmul.mubr.f32.vlgmr.msra.gmra.mxu0 %v649_v20  ;;  %v718_v41 = vand.u32 4294901760, %v717_v27  ;;  %v724_v42 = vand.u32 4294901760, %v723_v28  ;;  %v728_v47 = vand.u32 4294901760, %v727_v29  ;;  %v734_v5 = vand.u32 4294901760, %v733_v38 }
  0xae   : > { %805 = vmatpush1.msra.mxu0 %v2298_v46  ;;  %862 = vmatprep.mubr.f32.mxu0 %v2057_v12 }
  0xaf   : > { %719 = vmatprep.subr.mxu1 %v718_v41  ;;  %808 = vmatprep.subr.mxu0 %v2315_v60  ;;  %v729_v48 = vsub.f32 %v727_v29, %v728_v47  ;;  %v735_v49 = vsub.f32 %v733_v38, %v734_v5  ;;  %v1168_v41 = vld [vmem:[%s2664_s3] sm:$0xf] }
  0xb0   : > { %725 = vmatpush1.msra.mxu1 %v724_v42  ;;  %811 = vmatpush1.msra.mxu0 %v2318_v61 }
  0xb1   : > { %814 = vmatprep.subr.mxu0 %v2328_v0  ;;  %v730_v52 = vand.u32 4294901760, %v729_v48  ;;  %v736_v53 = vand.u32 4294901760, %v735_v49  ;;  %2027 = vset.pattern.permute.xlu0 %v2058_v9 }
  0xb2   : > { %817 = vmatpush1.msra.mxu0 %v2331_v1  ;;  %2028 = vset.pattern.permute.xlu1 %v2058_v9 }
  0xb3   : > { %731 = vmatprep.subr.mxu1 %v730_v52  ;;  %820 = vmatprep.subr.mxu0 %v715_v62 }
  0xb4   : > { %737 = vmatpush1.msra.mxu1 %v736_v53  ;;  %823 = vmatpush1.msra.mxu0 %v721_v63 }
  0xb5   : > { %772 = vmatmul.mubr.f32.vlgmr.msra.gmra.mxu1 %v2259_v10  ;;  %826 = vmatprep.subr.mxu0 %v727_v29 }
  0xb6   : > { %894 = vmatprep.subr.mxu1 %v2277_v32  ;;  %829 = vmatpush1.msra.mxu0 %v733_v38 }
  0xb7   : > { %896 = vmatpush1.msra.mxu1 %v2279_v33  ;;  %865 = vmatmul.mubr.f32.vlgmr.msra.gmra.mxu0 %v2287_v40 }
  0xb8   : > { %898 = vmatprep.subr.mxu1 %v2301_v50  ;;  %980 = vmatprep.subr.mxu0 %v680_v54 }
  0xb9   : > { %900 = vmatpush1.msra.mxu1 %v2303_v51  ;;  %984 = vmatpush1.msra.mxu0 %v686_v55 }
  0xba   : > { %902 = vmatprep.subr.mxu1 %v2290_v43  ;;  %988 = vmatprep.subr.mxu0 %v692_v11 }
  0xbb   : > { %904 = vmatpush1.msra.mxu1 %v2292_v44  ;;  %992 = vmatpush1.msra.mxu0 %v698_v14 }
  0xbc   : > { %906 = vmatprep.subr.mxu1 %v2361_v58  ;;  %996 = vmatprep.subr.mxu0 %v704_v4 }
  0xbd   : > { %908 = vmatpush1.msra.mxu1 %v2363_v59  ;;  %1000 = vmatpush1.msra.mxu0 %v710_v34 }
  0xbe   : > { %910 = vmatprep.subr.mxu1 %v2369_v21  ;;  %1004 = vmatprep.subr.mxu0 %v716_v23 }
  0xbf   : > { %912 = vmatpush1.msra.mxu1 %v2371_v22  ;;  %945 = vmatprep.mubr.f32.mxu1 %v2057_v12 }
  0xc0   : > { %1008 = vmatpush1.msra.mxu0 %v722_v24  ;;  %949 = vmatmul.mubr.f32.vlgmr.msra.gmra.mxu1 %v647_v35 }
  0xc1   : > { %1012 = vmatprep.subr.mxu0 %v728_v47  ;;  %1080 = vmatprep.subr.mxu1 %v2277_v32 }
  0xc2   : > { %1016 = vmatpush1.msra.mxu0 %v734_v5  ;;  %1049 = vmatprep.mubr.f32.mxu0 %v2057_v12 }
  0xc3   : > { %1082 = vmatpush1.msra.mxu1 %v2279_v33  ;;  %1051 = vmatmul.mubr.f32.vlgmr.msra.gmra.mxu0 %v2259_v10 }
  0xc4   : > { %1084 = vmatprep.subr.mxu1 %v2301_v50  ;;  %1131 = vmatprep.mubr.f32.mxu1 %v2057_v12 }
  0xc5   : > { %1086 = vmatpush1.msra.mxu1 %v2303_v51  ;;  %1388 = vmatprep.mubr.f32.mxu0 %v2057_v12 }
  0xc6   : > { %1088 = vmatprep.subr.mxu1 %v2290_v43 }
  0xc7   : > { %1090 = vmatpush1.msra.mxu1 %v2292_v44 }
  0xc8   : > { %1092 = vmatprep.subr.mxu1 %v2361_v58 }
  0xc9   : > { %1094 = vmatpush1.msra.mxu1 %v2363_v59 }
  0xca   : > { %1096 = vmatprep.subr.mxu1 %v2369_v21 }
  0xcb   : > { %1098 = vmatpush1.msra.mxu1 %v2371_v22 }
  0xcc   : > { %1133 = vmatmul.mubr.f32.vlgmr.msra.gmra.mxu1 %v2259_v10 }
  0xcd   : > { %1514 = vmatprep.mubr.f32.mxu1 %v2057_v12 }
 0x16d   : > { %v651_v32 = vpop.f32.mrf.mxu0 }
 0x16f   : > { %v653_v33 = vpop.f32.mrf.mxu0 }
 0x175   : > { %v773_v40 = vpop.f32.mrf.mxu1 }
 0x176   : > { %v774_v43 = vadd.f32 %v773_v40, %v651_v32 }
 0x177   : > { %v775_v45 = vpop.f32.mrf.mxu1  ;;  %v866_v46 = vpop.f32.mrf.mxu0 }
 0x178   : > { %v776_v44 = vadd.f32 %v775_v45, %v653_v33  ;;  %v867_v54 = vadd.f32 %v866_v46, %v774_v43 }
 0x179   : > { %v868_v51 = vpop.f32.mrf.mxu0 }
 0x17a   : > { %v869_v61 = vadd.f32 %v868_v51, %v776_v44 }
 0x180   : > { %v950_v50 = vpop.f32.mrf.mxu1 }
 0x181   : > { %v951_v0 = vadd.f32 %v950_v50, %v867_v54 }
 0x182   : > { %v952_v55 = vpop.f32.mrf.mxu1 }
 0x183   : > { %v1052_v60 = vpop.f32.mrf.mxu0  ;;  %v953_v1 = vadd.f32 %v952_v55, %v869_v61 }
 0x184   : > { %v1053_v14 = vadd.f32 %v1052_v60, %v951_v0 }
 0x185   : > { %v1054_v11 = vpop.f32.mrf.mxu0 }
 0x186   : > { %v1055_v4 = vadd.f32 %v1054_v11, %v953_v1 }
 0x18c   : > { %v1134_v10 = vpop.f32.mrf.mxu1 }
 0x18d   : > { %v1135_v34 = vadd.f32 %v1134_v10, %v1053_v14 }
 0x18e   : > { %v1136_v35 = vpop.f32.mrf.mxu1 }
 0x18f   : > { %v1137_v58 = vadd.f32 %v1136_v35, %v1055_v4  ;;  %v1139_v59 = vsel %vm563_vm7, %v1135_v34, 0.0 }
 0x191   : > { %v1140_v62 = vsel %vm563_vm7, %v1137_v58, 0.0 }
 0x192   : > { %v1141_v63 = vadd.f32 %v1140_v62, %v1139_v59 }
 0x194   : > { %1142 = vadd.xlane.f32.xlu0 %v1141_v63 }
 0x1aa   : > { %1163 = vperm.xlu0 %2027, %v1160_v6  }
 0x21d   : > { %v1143_v20 = vpop.xlane.xlu0 %1142 }
 0x21e   : > { %v1145_v21 = vmul.f32 0.00390625, %v1143_v20 }
 0x220   : > { %v1146_v22 = vsub.f32 %v1135_v34, %v1145_v21  ;;  %v1147_v23 = vsub.f32 %v1137_v58, %v1145_v21 }
 0x222   : > { %v1148_v24 = vmul.f32 %v1146_v22, %v1146_v22  ;;  %v1149_v27 = vmul.f32 %v1147_v23, %v1147_v23 }
 0x224   : > { %v1150_v28 = vsel %vm563_vm7, %v1148_v24, 0.0  ;;  %v1151_v29 = vsel %vm563_vm7, %v1149_v27, 0.0 }
 0x225   : > { %v1152_v38 = vadd.f32 %v1151_v29, %v1150_v28  ;;  %v1164_v49 = vpop.permute.xlu0 %1163 }
 0x227   : > { %1153 = vadd.xlane.f32.xlu1 %v1152_v38 }
 0x238   : > { %1171 = vperm.xlu1 %2028, %v1168_v41  }
 0x2b0   : > { %v1154_v42 = vpop.xlane.xlu1 %1153 }
 0x2b1   : > { %v1155_v47 = vmul.f32 0.00390625, %v1154_v42 }
 0x2b3   : > { %v1156_v5 = vadd.f32 1e-06, %v1155_v47 }
 0x2b4   : > { %v1172_v32 = vpop.permute.xlu1 %1171 }
 0x2b5   : > { %2030 = vrsqrt.f32 %v1156_v5 }
 0x2c2   : > { %v2031_v48 = vpop.eup %2030 }
 0x2c3   : > { %v1158_v52 = vmul.f32 %v2031_v48, %v1146_v22  ;;  %v1159_v53 = vmul.f32 %v2031_v48, %v1147_v23 }
 0x2c5   : > { %v1166_v33 = vmul.f32 %v1164_v49, %v1158_v52  ;;  %v1167_v40 = vmul.f32 %v1164_v49, %v1159_v53 }
 0x2c7   : > { %v1174_v45 = vadd.f32 %v1172_v32, %v1166_v33  ;;  %v1175_v46 = vadd.f32 %v1172_v32, %v1167_v40 }
 0x2c9   : > { %v1178_v43 = vmul.f32 1.442695, %v1174_v45  ;;  %v1180_v50 = vmul.f32 1.442695, %v1175_v46  ;;  %vm1176_vm10 = vcmp.gt.f32.partialorder %v1174_v45, 0.0  ;;  %vm1177_vm11 = vcmp.gt.f32.partialorder %v1175_v46, 0.0 }
 0x2cb   : > { %2032 = vpow2.f32 %v1178_v43 }
 0x2cc   : > { %2034 = vpow2.f32 %v1180_v50 }
 0x2d8   : > { %v2033_v44 = vpop.eup %2032 }
 0x2d9   : > { %v2035_v51 = vpop.eup %2034  ;;  %v2002_v54 = vadd.f32 -1.0, %v2033_v44 }
 0x2da   : > { %v2003_v55 = vadd.f32 -1.0, %v2035_v51  ;;  %v1294_v51 = vld [vmem:[%s2665_s4] sm:$0xf] }
 0x2db   : > { %v1184_v60 = vsel %vm1176_vm10, %v1174_v45, %v2002_v54 }
 0x2dc   : > { %v1185_v61 = vsel %vm1177_vm11, %v1175_v46, %v2003_v55  ;;  %v1238_v0 = vmul.f32 %v1184_v60, %v2133_v7  ;;  %1258 = vrot.lane.b32.xlu0 %v1184_v60, %s2052_s16  ;;  %1284 = vrot.lane.b32.xlu1 %v1184_v60, %s2050_s14 }
 0x2dd   : > { %v1239_v1 = vmul.f32 %v1185_v61, %v2136_v8 }
 0x2de   : > { %1240 = vst [vmem:[#allocation2 + $0x48] sm:$0xf] %v1238_v0 }
 0x2df   : > { %1241 = vst [vmem:[#allocation2 + $0x28] sm:$0xf] %v1239_v1 }
 0x2e0   : > { %1222 = vrot.lane.b32.xlu0 %v1184_v60, %s2053_s17  ;;  %1286 = vrot.lane.b32.xlu1 %v1185_v61, %s2050_s14 }
 0x2e4   : > { %1196 = vrot.lane.b32.xlu0 %v1184_v60, %s2054_s18  ;;  %1268 = vrot.lane.b32.xlu1 %v1184_v60, %s2049_s13 }
 0x2e8   : > { %1212 = vrot.lane.b32.xlu0 %v1184_v60, %s2055_s19  ;;  %1270 = vrot.lane.b32.xlu1 %v1185_v61, %s2049_s13 }
 0x2ec   : > { %1186 = vrot.lane.b32.xlu0 %v1184_v60, %s2056_s20  ;;  %1242 = vrot.lane.b32.xlu1 %v1184_v60, %s2051_s15  ;;  %v1306_v60 = vsel %vm559_vm4, %v1294_v51, 0 }
 0x2f0   : > { %1244 = vrot.lane.b32.xlu1 %v1185_v61, %s2051_s15 }
 0x2f4   : > { %1260 = vrot.lane.b32.xlu1 %v1185_v61, %s2052_s16 }
 0x2f8   : > { %1224 = vrot.lane.b32.xlu1 %v1185_v61, %s2053_s17 }
 0x2fc   : > { %1198 = vrot.lane.b32.xlu1 %v1185_v61, %s2054_s18 }
 0x300   : > { %1214 = vrot.lane.b32.xlu1 %v1185_v61, %s2055_s19 }
 0x304   : > { %1188 = vrot.lane.b32.xlu1 %v1185_v61, %s2056_s20 }
 0x34e   : > { %v1285_v7 = vpop.permute.xlu1 %1284  ;;  %v1259_v20 = vpop.permute.xlu0 %1258 }
 0x352   : > { %v1287_v8 = vpop.permute.xlu1 %1286  ;;  %v1223_v47 = vpop.permute.xlu0 %1222 }
 0x353   : > { %v1288_v11 = vsel %vm530_vm2, %v1285_v7, %v1287_v8  ;;  %v1289_v14 = vsel %vm530_vm2, %v1287_v8, %v1285_v7 }
 0x354   : > { %v1290_v10 = vmul.f32 %v1288_v11, %v2192_v30  ;;  %v1291_v4 = vmul.f32 %v1289_v14, %v2195_v31 }
 0x356   : > { %1292 = vst [vmem:[#allocation2 + $0x40] sm:$0xf] %v1290_v10  ;;  %1293 = vst [vmem:[#allocation2 + $0x38] sm:$0xf] %v1291_v4  ;;  %v1269_v34 = vpop.permute.xlu1 %1268  ;;  %v1197_v50 = vpop.permute.xlu0 %1196 }
 0x35a   : > { %v1271_v35 = vpop.permute.xlu1 %1270  ;;  %v1213_v10 = vpop.permute.xlu0 %1212 }
 0x35b   : > { %v1272_v58 = vsel %vm502_vm0, %v1269_v34, %v1271_v35  ;;  %v1273_v59 = vsel %vm502_vm0, %v1271_v35, %v1269_v34  ;;  %v2521_v35 = vand.u32 4294901760, %v1306_v60 }
 0x35c   : > { %v1274_v62 = vmul.f32 %v1272_v58, %v2163_v17  ;;  %v1275_v63 = vmul.f32 %v1273_v59, %v2166_v18 }
 0x35d   : > { %v1304_v6 = vld [vmem:[#allocation2 + $0x38] sm:$0xf]  ;;  %v1303_v9 = vld [vmem:[#allocation2 + $0x40] sm:$0xf] }
 0x35e   : > { %v1278_v30 = vrot.slane %v1274_v62, 4  ;;  %v1279_v21 = vrot.slane %v1275_v63, 4  ;;  %v1243_v31 = vpop.permute.xlu1 %1242  ;;  %v1312_v22 = vsel %vm563_vm7, %v1304_v6, 0  ;;  %v1309_v23 = vsel %vm563_vm7, %v1303_v9, 0 }
 0x35f   : > { %v2469_v24 = vand.u32 4294901760, %v1312_v22  ;;  %v2471_v27 = vand.u32 4294901760, %v1309_v23 }
 0x360   : > { %1282 = vst [vmem:[#allocation2 + $0x8] sm:$0xf0] %v1278_v30  ;;  %1283 = vst [vmem:[#allocation2 + $0x20] sm:$0xf0] %v1279_v21 }
 0x361   : > { %1337 = vmatprep.subr.mxu0 %v2469_v24  ;;  %v2475_v17 = vsub.f32 %v1309_v23, %v2471_v27  ;;  %v2478_v18 = vsub.f32 %v1312_v22, %v2469_v24 }
 0x362   : > { %1339 = vmatpush1.msra.mxu0 %v2471_v27  ;;  %v1245_v28 = vpop.permute.xlu1 %1244 }
 0x363   : > { %v1246_v29 = vsel %vm452_vm1, %v1243_v31, %v1245_v28  ;;  %v1247_v38 = vsel %vm452_vm1, %v1245_v28, %v1243_v31  ;;  %v1424_v41 = vand.u32 4294901760, %v2478_v18  ;;  %v1430_v42 = vand.u32 4294901760, %v2475_v17 }
 0x364   : > { %v1248_v5 = vmul.f32 %v1246_v29, %v2181_v25  ;;  %v1249_v48 = vmul.f32 %v1247_v38, %v2184_v26 }
 0x365   : > { %v1425_v49 = vsub.f32 %v2478_v18, %v1424_v41  ;;  %v1431_v52 = vsub.f32 %v2475_v17, %v1430_v42 }
 0x366   : > { %v1252_v53 = vrot.slane %v1248_v5, 4  ;;  %v1253_v32 = vrot.slane %v1249_v48, 4  ;;  %v1261_v33 = vpop.permute.xlu1 %1260 }
 0x367   : > { %v1262_v40 = vsel %vm480_vm3, %v1259_v20, %v1261_v33  ;;  %v1263_v45 = vsel %vm480_vm3, %v1261_v33, %v1259_v20  ;;  %v1426_v25 = vand.u32 4294901760, %v1425_v49  ;;  %v1432_v46 = vand.u32 4294901760, %v1431_v52 }
 0x368   : > { %1256 = vst [vmem:[#allocation2 + $0x48] sm:$0xf0] %v1252_v53  ;;  %1257 = vst [vmem:[#allocation2 + $0x28] sm:$0xf0] %v1253_v32  ;;  %v1264_v26 = vmul.f32 %v1262_v40, %v2199_v36  ;;  %v1265_v43 = vmul.f32 %v1263_v45, %v2202_v37 }
 0x369   : > { %1427 = vmatprep.subr.mxu1 %v1426_v25 }
 0x36a   : > { %1266 = vst [vmem:[#allocation2 + $0x8] sm:$0xf] %v1264_v26  ;;  %1267 = vst [vmem:[#allocation2 + $0x20] sm:$0xf] %v1265_v43  ;;  %1433 = vmatpush1.msra.mxu1 %v1432_v46  ;;  %v1225_v44 = vpop.permute.xlu1 %1224 }
 0x36b   : > { %v1226_v54 = vsel %vm405_vm5, %v1223_v47, %v1225_v44  ;;  %v1227_v55 = vsel %vm405_vm5, %v1225_v44, %v1223_v47  ;;  %v2550_v47 = vsub.f32 %v1306_v60, %v2521_v35 }
 0x36c   : > { %v1228_v36 = vmul.f32 %v1227_v55, %v2230_v56  ;;  %v1229_v37 = vmul.f32 %v1226_v54, %v2233_v57 }
 0x36d   : > { %v1391_v25 = vand.u32 4294901760, %v2550_v47 }
 0x36e   : > { %v1232_v61 = vrot.slane %v1228_v36, 4  ;;  %v1233_v0 = vrot.slane %v1229_v37, 4  ;;  %v1199_v1 = vpop.permute.xlu1 %1198 }
 0x36f   : > { %v1200_v7 = vsel %vm355_vm6, %v1197_v50, %v1199_v1  ;;  %v1201_v8 = vsel %vm355_vm6, %v1199_v1, %v1197_v50  ;;  %v1300_v11 = vld [vmem:[#allocation2 + $0x28] sm:$0xff]  ;;  %v1392_v44 = vsub.f32 %v2550_v47, %v1391_v25 }
 0x370   : > { %v1299_v14 = vld [vmem:[#allocation2 + $0x48] sm:$0xff]  ;;  %1236 = vst [vmem:[#allocation2 + $0x18] sm:$0xf0] %v1232_v61  ;;  %1237 = vst [vmem:[#allocation2 + $0x10] sm:$0xf0] %v1233_v0  ;;  %v1202_v56 = vmul.f32 %v1201_v8, %v2251_v2  ;;  %v1203_v57 = vmul.f32 %v1200_v7, %v2254_v3  ;;  %v2517_v4 = vand.u32 4294901760, %v1300_v11 }
 0x371   : > { %v2519_v34 = vand.u32 4294901760, %v1299_v14  ;;  %v1302_v58 = vld [vmem:[#allocation2 + $0x20] sm:$0xff]  ;;  %v1301_v59 = vld [vmem:[#allocation2 + $0x8] sm:$0xff]  ;;  %v1393_v61 = vand.u32 4294901760, %v1392_v44 }
 0x372   : > { %v1206_v62 = vrot.slane %v1202_v56, 4  ;;  %v1207_v63 = vrot.slane %v1203_v57, 4  ;;  %v1215_v6 = vpop.permute.xlu1 %1214  ;;  %v2523_v9 = vand.u32 4294901760, %v1302_v58  ;;  %v2525_v20 = vand.u32 4294901760, %v1301_v59 }
 0x373   : > { %v1216_v2 = vsel %vm383_vm8, %v1213_v10, %v1215_v6  ;;  %v1217_v3 = vsel %vm383_vm8, %v1215_v6, %v1213_v10  ;;  %v2532_v30 = vsub.f32 %v1299_v14, %v2519_v34  ;;  %v2535_v21 = vsub.f32 %v1300_v11, %v2517_v4 }
 0x374   : > { %1210 = vst [vmem:[#allocation2 + $0x30] sm:$0xf0] %v1206_v62  ;;  %1211 = vst [vmem:[#allocation2] sm:$0xf0] %v1207_v63  ;;  %v1218_v31 = vmul.f32 %v1217_v3, %v2262_v15  ;;  %v1219_v22 = vmul.f32 %v1216_v2, %v2265_v16  ;;  %1341 = vmatprep.subr.mxu0 %v2523_v9  ;;  %v2541_v23 = vsub.f32 %v1301_v59, %v2525_v20  ;;  %v1187_v15 = vpop.permute.xlu0 %1186 }
 0x375   : > { %v2544_v28 = vsub.f32 %v1302_v58, %v2523_v9  ;;  %1343 = vmatpush1.msra.mxu0 %v2525_v20  ;;  %v1448_v29 = vand.u32 4294901760, %v2535_v21  ;;  %v1454_v38 = vand.u32 4294901760, %v2532_v30 }
 0x376   : > { %1220 = vst [vmem:[#allocation2 + $0x18] sm:$0xf] %v1218_v31  ;;  %1221 = vst [vmem:[#allocation2 + $0x10] sm:$0xf] %v1219_v22  ;;  %1345 = vmatprep.subr.mxu0 %v2517_v4  ;;  %v1189_v16 = vpop.permute.xlu1 %1188  ;;  %v1442_v48 = vand.u32 4294901760, %v2541_v23 }
 0x377   : > { %v1436_v5 = vand.u32 4294901760, %v2544_v28  ;;  %v1190_v49 = vsel %vm333_vm9, %v1187_v15, %v1189_v16  ;;  %v1191_v52 = vsel %vm333_vm9, %v1189_v16, %v1187_v15  ;;  %1347 = vmatpush1.msra.mxu0 %v2519_v34  ;;  %v1449_v53 = vsub.f32 %v2535_v21, %v1448_v29 }
 0x378   : > { %v1192_v32 = vmul.f32 %v1191_v52, %v2269_v19  ;;  %v1193_v33 = vmul.f32 %v1190_v49, %v2284_v39  ;;  %v1443_v45 = vsub.f32 %v2541_v23, %v1442_v48  ;;  %v1455_v13 = vsub.f32 %v2532_v30, %v1454_v38  ;;  %v1903_v49 = vld [vmem:[%s2666_s5] sm:$0xf] }
 0x379   : > { %v1437_v40 = vsub.f32 %v2544_v28, %v1436_v5  ;;  %v1450_v39 = vand.u32 4294901760, %v1449_v53 }
 0x37a   : > { %1194 = vst [vmem:[#allocation2 + $0x30] sm:$0xf] %v1192_v32  ;;  %1195 = vst [vmem:[#allocation2] sm:$0xf] %v1193_v33  ;;  %v1444_v19 = vand.u32 4294901760, %v1443_v45  ;;  %v1456_v26 = vand.u32 4294901760, %v1455_v13 }
 0x37b   : > { %v1438_v46 = vand.u32 4294901760, %v1437_v40 }
 0x37d   : > { %1439 = vmatprep.subr.mxu1 %v1438_v46  ;;  %v1298_v43 = vld [vmem:[#allocation2 + $0x10] sm:$0xff]  ;;  %v1297_v50 = vld [vmem:[#allocation2 + $0x18] sm:$0xff] }
 0x37e   : > { %1445 = vmatpush1.msra.mxu1 %v1444_v19  ;;  %v2578_v51 = vand.u32 4294901760, %v1298_v43  ;;  %v2580_v54 = vand.u32 4294901760, %v1297_v50  ;;  %v1911_v19 = vld [vmem:[%s2667_s6] sm:$0xf] }
 0x37f   : > { %1451 = vmatprep.subr.mxu1 %v1450_v39 }
 0x380   : > { %1457 = vmatpush1.msra.mxu1 %v1456_v26  ;;  %1349 = vmatprep.subr.mxu0 %v2578_v51  ;;  %v1465_v55 = vsub.f32 %v1297_v50, %v2580_v54  ;;  %v1459_v36 = vsub.f32 %v1298_v43, %v2578_v51 }
 0x381   : > { %1351 = vmatpush1.msra.mxu0 %v2580_v54  ;;  %v1296_v37 = vld [vmem:[#allocation2] sm:$0xff]  ;;  %v1295_v60 = vld [vmem:[#allocation2 + $0x30] sm:$0xff] }
 0x382   : > { %v2586_v0 = vand.u32 4294901760, %v1296_v37  ;;  %v2588_v1 = vand.u32 4294901760, %v1295_v60  ;;  %v1460_v7 = vand.u32 4294901760, %v1459_v36  ;;  %v1466_v8 = vand.u32 4294901760, %v1465_v55 }
 0x384   : > { %1353 = vmatprep.subr.mxu0 %v2586_v0  ;;  %v1477_v11 = vsub.f32 %v1295_v60, %v2588_v1  ;;  %v1461_v14 = vsub.f32 %v1459_v36, %v1460_v7  ;;  %v1467_v10 = vsub.f32 %v1465_v55, %v1466_v8  ;;  %v1471_v56 = vsub.f32 %v1296_v37, %v2586_v0 }
 0x385   : > { %1355 = vmatpush1.msra.mxu0 %v2588_v1 }
 0x386   : > { %1546 = vmatprep.subr.mxu0 %v2478_v18  ;;  %1394 = vmatmul.mubr.f32.vlgmr.msra.gmra.mxu0 %v1393_v61  ;;  %v1462_v57 = vand.u32 4294901760, %v1461_v14  ;;  %v1468_v58 = vand.u32 4294901760, %v1467_v10  ;;  %v1472_v59 = vand.u32 4294901760, %v1471_v56  ;;  %v1478_v62 = vand.u32 4294901760, %v1477_v11 }
 0x387   : > { %1549 = vmatpush1.msra.mxu0 %v2475_v17  ;;  %1606 = vmatprep.mubr.f32.mxu0 %v2057_v12 }
 0x388   : > { %1463 = vmatprep.subr.mxu1 %v1462_v57  ;;  %1552 = vmatprep.subr.mxu0 %v2544_v28  ;;  %v1473_v63 = vsub.f32 %v1471_v56, %v1472_v59  ;;  %v1479_v6 = vsub.f32 %v1477_v11, %v1478_v62 }
 0x389   : > { %1469 = vmatpush1.msra.mxu1 %v1468_v58  ;;  %1555 = vmatpush1.msra.mxu0 %v2541_v23 }
 0x38a   : > { %1558 = vmatprep.subr.mxu0 %v2535_v21  ;;  %v1474_v2 = vand.u32 4294901760, %v1473_v63  ;;  %v1480_v3 = vand.u32 4294901760, %v1479_v6 }
 0x38b   : > { %1561 = vmatpush1.msra.mxu0 %v2532_v30 }
 0x38c   : > { %1475 = vmatprep.subr.mxu1 %v1474_v2  ;;  %1564 = vmatprep.subr.mxu0 %v1459_v36 }
 0x38d   : > { %1481 = vmatpush1.msra.mxu1 %v1480_v3  ;;  %1567 = vmatpush1.msra.mxu0 %v1465_v55 }
 0x38e   : > { %1516 = vmatmul.mubr.f32.vlgmr.msra.gmra.mxu1 %v2521_v35  ;;  %1570 = vmatprep.subr.mxu0 %v1471_v56 }
 0x38f   : > { %1638 = vmatprep.subr.mxu1 %v2469_v24  ;;  %1573 = vmatpush1.msra.mxu0 %v1477_v11 }
 0x390   : > { %1640 = vmatpush1.msra.mxu1 %v2471_v27  ;;  %1609 = vmatmul.mubr.f32.vlgmr.msra.gmra.mxu0 %v2550_v47 }
 0x391   : > { %1642 = vmatprep.subr.mxu1 %v2523_v9  ;;  %1724 = vmatprep.subr.mxu0 %v1424_v41 }
 0x392   : > { %1644 = vmatpush1.msra.mxu1 %v2525_v20  ;;  %1728 = vmatpush1.msra.mxu0 %v1430_v42 }
 0x393   : > { %1646 = vmatprep.subr.mxu1 %v2517_v4  ;;  %1732 = vmatprep.subr.mxu0 %v1436_v5 }
 0x394   : > { %1648 = vmatpush1.msra.mxu1 %v2519_v34  ;;  %1736 = vmatpush1.msra.mxu0 %v1442_v48 }
 0x395   : > { %1650 = vmatprep.subr.mxu1 %v2578_v51  ;;  %1740 = vmatprep.subr.mxu0 %v1448_v29 }
 0x396   : > { %1652 = vmatpush1.msra.mxu1 %v2580_v54  ;;  %1744 = vmatpush1.msra.mxu0 %v1454_v38 }
 0x397   : > { %1654 = vmatprep.subr.mxu1 %v2586_v0  ;;  %1748 = vmatprep.subr.mxu0 %v1460_v7 }
 0x398   : > { %1656 = vmatpush1.msra.mxu1 %v2588_v1  ;;  %1689 = vmatprep.mubr.f32.mxu1 %v2057_v12 }
 0x399   : > { %1752 = vmatpush1.msra.mxu0 %v1466_v8  ;;  %1693 = vmatmul.mubr.f32.vlgmr.msra.gmra.mxu1 %v1391_v25 }
 0x39a   : > { %1756 = vmatprep.subr.mxu0 %v1472_v59  ;;  %1824 = vmatprep.subr.mxu1 %v2469_v24 }
 0x39b   : > { %1760 = vmatpush1.msra.mxu0 %v1478_v62  ;;  %1793 = vmatprep.mubr.f32.mxu0 %v2057_v12 }
 0x39c   : > { %1826 = vmatpush1.msra.mxu1 %v2471_v27  ;;  %1795 = vmatmul.mubr.f32.vlgmr.msra.gmra.mxu0 %v2521_v35 }
 0x39d   : > { %1828 = vmatprep.subr.mxu1 %v2523_v9  ;;  %1875 = vmatprep.mubr.f32.mxu1 %v2057_v12 }
 0x39e   : > { %1830 = vmatpush1.msra.mxu1 %v2525_v20 }
 0x39f   : > { %1832 = vmatprep.subr.mxu1 %v2517_v4 }
 0x3a0   : > { %1834 = vmatpush1.msra.mxu1 %v2519_v34 }
 0x3a1   : > { %1836 = vmatprep.subr.mxu1 %v2578_v51 }
 0x3a2   : > { %1838 = vmatpush1.msra.mxu1 %v2580_v54 }
 0x3a3   : > { %1840 = vmatprep.subr.mxu1 %v2586_v0 }
 0x3a4   : > { %1842 = vmatpush1.msra.mxu1 %v2588_v1  ;;  %v2040_v1 = vld [vmem:[%s2120_s10] sm:$0xff] }
 0x3a5   : > { %1877 = vmatmul.mubr.f32.vlgmr.msra.gmra.mxu1 %v2521_v35 }
 0x446   : > { %v1395_v24 = vpop.f32.mrf.mxu0 }
 0x448   : > { %v1397_v27 = vpop.f32.mrf.mxu0 }
 0x44e   : > { %v1517_v17 = vpop.f32.mrf.mxu1 }
 0x44f   : > { %v1518_v41 = vadd.f32 %v1517_v17, %v1395_v24 }
 0x450   : > { %v1519_v12 = vpop.f32.mrf.mxu1  ;;  %v1610_v18 = vpop.f32.mrf.mxu0 }
 0x451   : > { %v1520_v4 = vadd.f32 %v1519_v12, %v1397_v27  ;;  %v1611_v34 = vadd.f32 %v1610_v18, %v1518_v41 }
 0x452   : > { %v1612_v9 = vpop.f32.mrf.mxu0 }
 0x453   : > { %v1613_v21 = vadd.f32 %v1612_v9, %v1520_v4 }
 0x459   : > { %v1694_v42 = vpop.f32.mrf.mxu1 }
 0x45a   : > { %v1695_v31 = vadd.f32 %v1694_v42, %v1611_v34 }
 0x45b   : > { %v1696_v20 = vpop.f32.mrf.mxu1 }
 0x45c   : > { %v1796_v30 = vpop.f32.mrf.mxu0  ;;  %v1697_v22 = vadd.f32 %v1696_v20, %v1613_v21 }
 0x45d   : > { %v1797_v28 = vadd.f32 %v1796_v30, %v1695_v31 }
 0x45e   : > { %v1798_v23 = vpop.f32.mrf.mxu0 }
 0x45f   : > { %v1799_v38 = vadd.f32 %v1798_v23, %v1697_v22 }
 0x465   : > { %v1878_v29 = vpop.f32.mrf.mxu1 }
 0x466   : > { %v1879_v35 = vadd.f32 %v1878_v29, %v1797_v28 }
 0x467   : > { %v1880_v47 = vpop.f32.mrf.mxu1 }
 0x468   : > { %v1881_v15 = vadd.f32 %v1880_v47, %v1799_v38  ;;  %v1883_v16 = vsel %vm563_vm7, %v1879_v35, 0.0 }
 0x46a   : > { %v1884_v5 = vsel %vm563_vm7, %v1881_v15, 0.0 }
 0x46b   : > { %v1885_v48 = vadd.f32 %v1884_v5, %v1883_v16 }
 0x46d   : > { %1886 = vadd.xlane.f32.xlu0 %v1885_v48 }
 0x483   : > { %1906 = vperm.xlu0 %2027, %v1903_v49  }
 0x4f6   : > { %v1887_v52 = vpop.xlane.xlu0 %1886 }
 0x4f7   : > { %v1888_v53 = vmul.f32 0.00390625, %v1887_v52 }
 0x4f9   : > { %v1889_v32 = vsub.f32 %v1879_v35, %v1888_v53  ;;  %v1890_v33 = vsub.f32 %v1881_v15, %v1888_v53 }
 0x4fb   : > { %v1891_v40 = vmul.f32 %v1889_v32, %v1889_v32  ;;  %v1892_v45 = vmul.f32 %v1890_v33, %v1890_v33 }
 0x4fd   : > { %v1893_v13 = vsel %vm563_vm7, %v1891_v40, 0.0  ;;  %v1894_v25 = vsel %vm563_vm7, %v1892_v45, 0.0 }
 0x4fe   : > { %v1895_v46 = vadd.f32 %v1894_v25, %v1893_v13  ;;  %v1907_v54 = vpop.permute.xlu0 %1906 }
 0x500   : > { %1896 = vadd.xlane.f32.xlu1 %v1895_v46 }
 0x511   : > { %1914 = vperm.xlu1 %2028, %v1911_v19  }
 0x589   : > { %v1897_v39 = vpop.xlane.xlu1 %1896 }
 0x58a   : > { %v1898_v26 = vmul.f32 0.00390625, %v1897_v39 }
 0x58c   : > { %v1899_v43 = vadd.f32 1e-06, %v1898_v26 }
 0x58d   : > { %v1915_v37 = vpop.permute.xlu1 %1914 }
 0x58e   : > { %2036 = vrsqrt.f32 %v1899_v43 }
 0x59b   : > { %v2037_v50 = vpop.eup %2036 }
 0x59c   : > { %v1901_v44 = vmul.f32 %v2037_v50, %v1889_v32  ;;  %v1902_v51 = vmul.f32 %v2037_v50, %v1890_v33 }
 0x59e   : > { %v1909_v55 = vmul.f32 %v1907_v54, %v1901_v44  ;;  %v1910_v36 = vmul.f32 %v1907_v54, %v1902_v51 }
 0x5a0   : > { %v1917_v60 = vadd.f32 %v1915_v37, %v1909_v55  ;;  %v1918_v61 = vadd.f32 %v1915_v37, %v1910_v36 }
 0x5a2   : > { %v1921_v0 = vcombine.low %v1917_v60, %v1918_v61 }
 0x5a4   : > { %v1923_v7 = vadd.f32 %v2040_v1, %v1921_v0 }
 0x5a6   : > { %v1925_v8 = vmul.f32 1.442695, %v1923_v7  ;;  %vm1924_vm12 = vcmp.gt.f32.partialorder %v1923_v7, 0.0 }
 0x5a8   : > { %2038 = vpow2.f32 %v1925_v8 }
 0x5b5   : > { %v2039_v11 = vpop.eup %2038 }
 0x5b6   : > { %v2004_v14 = vadd.f32 -1.0, %v2039_v11 }
 0x5b8   : > { %v1928_v10 = vsel %vm1924_vm12, %v1923_v7, %v2004_v14 }
 0x5b9   : > { %1929 = vst [vmem:[%s305_s23] sm:$0xff] %v1928_v10 }
 0x5ba PF: > { %s18_s27 = sadd.s32 1, %s2047_s27  }
 0x5bb   : > { %p15_p4 = scmp.ge.s32.totalorder %s18_s27, 4  }
 0x5bd   :  { %17 = sbr.rel (!%p15_p4) target bundleno = 1 (0x1), region = 90 }

</bundles_post_ra>
